<compile_context>
chip_gen: v7x
topology: tpu7x:2x2x1
jax: 0.10.0
libtpu: 0.0.40
codegen_flags: <defaults>
</compile_context>

<pallas_src>
import functools
import math

import jax
import jax.numpy as jnp
from jax.experimental import pallas as pl
from jax.experimental.pallas import tpu as pltpu


# ----------------------------------------------------------------------------
# Kernels
# ----------------------------------------------------------------------------
def _merge_kernel(pos_ref, x_ref, o_ref):
    # pos_ref: (tile_rows, 1)   x_ref: (tile_rows, E)   o_ref: (tile_rows, E+1)
    # Single full-tile store: the lane-dim concat lowers to a 1-lane shift
    # (XLU) + select into lane 0 (VALU), then ONE (masked) vst per 8 rows.
    o_ref[...] = jnp.concatenate([pos_ref[...], x_ref[...]], axis=1)


def _two_store_kernel(pos_ref, x_ref, o_ref):
    # Fallback (2 masked vst per 8 rows) if minor-dim concat does not lower.
    e = x_ref.shape[1]
    o_ref[:, pl.ds(0, 1)] = pos_ref[...]
    o_ref[:, pl.ds(1, e)] = x_ref[...]


# ----------------------------------------------------------------------------
# Wrapper
# ----------------------------------------------------------------------------
_FUSED_STORE_OK = True  # flipped off once if the fused kernel fails to lower


def _target_block_bytes() -> int:
    """Per-generation output-block size target (best-effort, safe default)."""
    try:
        info = pltpu.get_tpu_info()
        vmem = getattr(info, "vmem_capacity_bytes", None)
        if vmem is not None and vmem <= 64 * 1024 * 1024:
            # v7x (64 MiB physical VMEM, ~3.2 TB/s HBM): bigger blocks amortize
            # the per-grid-step overhead; double-buffered in+out ~16 MiB stays
            # well under the 32 MiB scoped default.
            return 4 * 1024 * 1024
    except Exception:
        pass
    # Safe everywhere: double-buffered in+out ~8 MiB < v5e's 16 MiB scoped VMEM.
    return 2 * 1024 * 1024


def _build_call(kernel, *, n_rows, E, E_out, tile_rows, grid, dtype, itemsize):
    return pl.pallas_call(
        kernel,
        out_shape=jax.ShapeDtypeStruct((n_rows, E_out), dtype),
        grid=grid,
        in_specs=[pl.BlockSpec((tile_rows, 1), lambda i: (i, 0)),    # pos column
                  pl.BlockSpec((tile_rows, E), lambda i: (i, 0))],   # x rows
        out_specs=pl.BlockSpec((tile_rows, E_out), lambda i: (i, 0)),
        # Pure memory streaming, no cross-iteration dependence.
        compiler_params=pltpu.CompilerParams(
            dimension_semantics=("parallel",)),
        # Advisory hint: 0 flops, pure bytes (pos read + x read + out write).
        cost_estimate=pl.CostEstimate(
            flops=0, transcendentals=0,
            bytes_accessed=n_rows * (1 + E + E_out) * itemsize),
    )


def index_pos_encoder(x: jax.Array, *, max_seq_len: int = 5000,
                      seq_tile: int | None = None) -> jax.Array:
    """x: [S, B, E] -> [S, B, E+1] (normalized index column concatenated with x)."""
    global _FUSED_STORE_OK

    S, B, E = x.shape
    E_out = E + 1
    n_rows = S * B
    itemsize = jnp.dtype(x.dtype).itemsize

    # The module's registered buffer, restricted to [:S], repeated over batch
    # and flattened to one value per (seq, batch) row.  Computed once in XLA
    # (tiny), so the kernel has zero per-element arithmetic and the values
    # bitwise-match arange(max_seq_len)/max_seq_len.
    pos_col = (jnp.arange(S, dtype=jnp.float32)
               / jnp.float32(max_seq_len)).astype(x.dtype)
    pos2 = jnp.broadcast_to(pos_col[:, None], (S, B)).reshape(n_rows, 1)
    x2 = x.reshape(n_rows, E)                       # free, contiguous reshape

    # Sublane granularity of the second-to-last block dim (dtype packing).
    sublane = {4: 8, 2: 16, 1: 32}.get(itemsize, 8)
    # seq_per_tile must be a multiple of m so tile_rows = seq_per_tile * B is a
    # multiple of the sublane granularity.
    m = sublane // math.gcd(B, sublane)

    if seq_tile is None:
        t_s = max(1, _target_block_bytes() // max(1, B * E_out * itemsize))
    else:
        t_s = int(seq_tile)
    t_s = max(m, (t_s // m) * m)

    if t_s >= S:
        tile_rows = n_rows                          # single full-extent block
        grid = (1,)
    else:
        tile_rows = t_s * B                         # multiple of `sublane`
        grid = (pl.cdiv(S, t_s),)                   # masked tail block

    call = functools.partial(
        _build_call, n_rows=n_rows, E=E, E_out=E_out, tile_rows=tile_rows,
        grid=grid, dtype=x.dtype, itemsize=itemsize)

    out2 = None
    if _FUSED_STORE_OK:
        try:
            # Eager pallas_call: lowering errors surface here (not under jit),
            # so a concat-lowering failure cleanly falls back below.
            out2 = call(_merge_kernel)(pos2, x2)
        except Exception:
            _FUSED_STORE_OK = False
    if out2 is None:
        out2 = call(_two_store_kernel)(pos2, x2)

    # TODO(synk): nn.Dropout(p=0.1) is stochastic in training mode; eval-mode
    # (identity) semantics are implemented here.
    return out2.reshape(S, B, E_out)                # free, contiguous reshape


def index_pos_encoder_ref(x: jax.Array, *, max_seq_len: int = 5000) -> jax.Array:
    """Pure-JAX reference matching the PyTorch forward (eval mode)."""
    S, B, _ = x.shape
    pos = (jnp.arange(max_seq_len, dtype=jnp.float32) / max_seq_len)[:, None]
    c = jnp.broadcast_to(pos[:S][:, None, :], (S, B, 1)).astype(x.dtype)
    return jnp.concatenate([c, x], axis=2)


if __name__ == "__main__":
    max_seq_len = 5000

    # Case 1: module-typical small shape -> single full-extent block.
    S, B, E = 8, 2, 32
    x = jax.random.normal(jax.random.PRNGKey(0), (S, B, E), dtype=jnp.float32)
    out = jax.block_until_ready(index_pos_encoder(x, max_seq_len=max_seq_len))
    ref = index_pos_encoder_ref(x, max_seq_len=max_seq_len)
    assert out.shape == (S, B, E + 1), out.shape
    assert out.dtype == x.dtype, out.dtype
    assert jnp.allclose(out, ref, atol=1e-6, rtol=1e-6), "mismatch (case 1)"

    # Case 2: forced small sequence tile -> multi-block grid with a partial
    # (masked) tail block, exercising the real tiling/pipelining path.
    S2, B2, E2 = 10, 2, 32
    x2 = jax.random.normal(jax.random.PRNGKey(0), (S2, B2, E2), dtype=jnp.float32)
    out2 = jax.block_until_ready(
        index_pos_encoder(x2, max_seq_len=max_seq_len, seq_tile=4))
    ref2 = index_pos_encoder_ref(x2, max_seq_len=max_seq_len)
    assert out2.shape == (S2, B2, E2 + 1), out2.shape
    assert jnp.allclose(out2, ref2, atol=1e-6, rtol=1e-6), "mismatch (case 2)"

    print("KERNEL_OK")
</pallas_src>

<mosaic_0001>
module attributes {stable_mosaic.version = 11 : i64} {
  func.func @_merge_kernel(%arg0: i32, %arg1: memref<16x1xf32, #tpu.memory_space<vmem>>, %arg2: memref<16x32xf32, #tpu.memory_space<vmem>>, %arg3: memref<16x33xf32, #tpu.memory_space<vmem>>) attributes {dimension_semantics = [#tpu.dimension_semantics<parallel>], iteration_bounds = array<i64: 1>, scalar_prefetch = 0 : i64, scratch_operands = 0 : i64, tpu.core_type = #tpu.core_type<tc>, window_params = [{transform_indices = @transform_0, window_bounds = array<i64: 16, 1>}, {transform_indices = @transform_1, window_bounds = array<i64: 16, 32>}, {transform_indices = @transform_2, window_bounds = array<i64: 16, 33>}]} {
    %c0 = arith.constant 0 : index
    %c0_0 = arith.constant 0 : index
    %0 = vector.load %arg1[%c0, %c0_0] : memref<16x1xf32, #tpu.memory_space<vmem>>, vector<16x1xf32>
    %c0_1 = arith.constant 0 : index
    %c0_2 = arith.constant 0 : index
    %1 = vector.load %arg2[%c0_1, %c0_2] : memref<16x32xf32, #tpu.memory_space<vmem>>, vector<16x32xf32>
    %2 = tpu.concatenate %0, %1 in 1 : vector<16x1xf32>, vector<16x32xf32> -> vector<16x33xf32>
    %c0_3 = arith.constant 0 : index
    %c0_4 = arith.constant 0 : index
    %3 = vector.load %arg3[%c0_3, %c0_4] : memref<16x33xf32, #tpu.memory_space<vmem>>, vector<16x33xf32>
    tpu.vector_store %arg3[%c0_3, %c0_4], %2 {strides = array<i32>} : memref<16x33xf32, #tpu.memory_space<vmem>>, vector<16x33xf32>,
    return
  }
  func.func @transform_0(%arg0: i32) -> (i32, i32) {
    %c0_i32 = arith.constant 0 : i32
    %c0_i32_0 = arith.constant 0 : i32
    return %arg0, %c0_i32 : i32, i32
  }
  func.func @transform_1(%arg0: i32) -> (i32, i32) {
    %c0_i32 = arith.constant 0 : i32
    %c0_i32_0 = arith.constant 0 : i32
    return %arg0, %c0_i32 : i32, i32
  }
  func.func @transform_2(%arg0: i32) -> (i32, i32) {
    %c0_i32 = arith.constant 0 : i32
    %c0_i32_0 = arith.constant 0 : i32
    return %arg0, %c0_i32 : i32, i32
  }
}

module attributes {stable_mosaic.version = 11 : i64} {
  func.func @_two_store_kernel(%arg0: i32, %arg1: memref<16x1xf32, #tpu.memory_space<vmem>>, %arg2: memref<16x32xf32, #tpu.memory_space<vmem>>, %arg3: memref<16x33xf32, #tpu.memory_space<vmem>>) attributes {dimension_semantics = [#tpu.dimension_semantics<parallel>], iteration_bounds = array<i64: 1>, scalar_prefetch = 0 : i64, scratch_operands = 0 : i64, tpu.core_type = #tpu.core_type<tc>, window_params = [{transform_indices = @transform_0, window_bounds = array<i64: 16, 1>}, {transform_indices = @transform_1, window_bounds = array<i64: 16, 32>}, {transform_indices = @transform_2, window_bounds = array<i64: 16, 33>}]} {
    %c0 = arith.constant 0 : index
    %c0_0 = arith.constant 0 : index
    %0 = vector.load %arg1[%c0, %c0_0] : memref<16x1xf32, #tpu.memory_space<vmem>>, vector<16x1xf32>
    %c0_1 = arith.constant 0 : index
    %c0_2 = arith.constant 0 : index
    %1 = vector.load %arg3[%c0_1, %c0_2] : memref<16x33xf32, #tpu.memory_space<vmem>>, vector<16x1xf32>
    tpu.vector_store %arg3[%c0_1, %c0_2], %0 {strides = array<i32>} : memref<16x33xf32, #tpu.memory_space<vmem>>, vector<16x1xf32>,
    %c0_3 = arith.constant 0 : index
    %c0_4 = arith.constant 0 : index
    %2 = vector.load %arg2[%c0_3, %c0_4] : memref<16x32xf32, #tpu.memory_space<vmem>>, vector<16x32xf32>
    %c0_5 = arith.constant 0 : index
    %c1 = arith.constant 1 : index
    %3 = vector.load %arg3[%c0_5, %c1] : memref<16x33xf32, #tpu.memory_space<vmem>>, vector<16x32xf32>
    tpu.vector_store %arg3[%c0_5, %c1], %2 {strides = array<i32>} : memref<16x33xf32, #tpu.memory_space<vmem>>, vector<16x32xf32>,
    return
  }
  func.func @transform_0(%arg0: i32) -> (i32, i32) {
    %c0_i32 = arith.constant 0 : i32
    %c0_i32_0 = arith.constant 0 : i32
    return %arg0, %c0_i32 : i32, i32
  }
  func.func @transform_1(%arg0: i32) -> (i32, i32) {
    %c0_i32 = arith.constant 0 : i32
    %c0_i32_0 = arith.constant 0 : i32
    return %arg0, %c0_i32 : i32, i32
  }
  func.func @transform_2(%arg0: i32) -> (i32, i32) {
    %c0_i32 = arith.constant 0 : i32
    %c0_i32_0 = arith.constant 0 : i32
    return %arg0, %c0_i32 : i32, i32
  }
}

</mosaic_0001>

<bundles_post_ra>
// kernel: tpu_custom_call.1
= control target key start
LH: loop header
LB: loop body
LE: loop exit
PB: predicated region body
PF: predicated region fallthrough
CT: control target
= control target key end

     0   :  { %s74_s11 = smov 1   ;;  %s117_s0 = inlined_call_operand.vmem [shape: f32[16,1], index: 0, kind: input, shape index: {}]   ;;  %s118_s1 = inlined_call_operand.vmem [shape: f32[16,32], index: 1, kind: input, shape index: {}]   ;;  %s119_s2 = inlined_call_operand.hbm [shape: f32[16,33], index: 2, kind: output, shape index: {}]  }
   0x1   :  { %v14_v0 = vld [vmem:[%s118_s1] sm:$0xff] }
   0x2   :  { %18 = vrot.lane.b32.xlu0 %v14_v0, %s74_s11 }
   0x3   :  { %7 = vsyncpa [#allocation3], 0  ;;  %v15_v1 = vld [vmem:[%s118_s1 + $0x8] sm:$0xff]  ;;  %vm24_vm0 = vcmask 7168   ;;  %v12_v2 = vld [vmem:[%s117_s0] sm:$0xff]  ;;  %vm27_vm1 = vcmask 269312  }
   0x4   :  { %s75_s16 = smov [#allocation2]   ;;  %v13_v5 = vld [vmem:[%s117_s0 + $0x8] sm:$0xff] }
   0x5   :  { %s35_s17 = sshll.u32 %s75_s16, 4  ;;  %s36_s17 = int_to_ptr.vmem [resolvable:$true] %s35_s17 }
   0x6   :  { %20 = vrot.lane.b32.xlu0 %v15_v1, %s74_s11  ;;  %s50_s1 = scalar_lea.vmem %s36_s17, 256  ;;  %p55_p1 = scmp.lt.s32.totalorder %s36_s17, %s36_s17 }
   0x7   :  { %p51_p0 = scmp.ne.s32.totalorder %s36_s17, %s50_s1  ;;  %p56_p2 = scmp.lt.s32.totalorder %s50_s1, %s50_s1 }
   0x9   :  { %p57_p3 = por %p56_p2, %p55_p1 }
   0xb   :  { %p58_p4 = pnand %p57_p3, %p51_p0 }
  0x74   :  { %v19_v3 = vpop.permute.xlu0 %18 }
  0x75   :  { %v25_v4 = vsel %vm24_vm0, %v12_v2, %v19_v3 }
  0x76   :  { %28 = vst.msk [vmem:[#allocation2] sm:$0xff] %vm27_vm1, %v25_v4 }
  0x78   :  { %v21_v6 = vpop.permute.xlu0 %20 }
  0x79   :  { %v26_v7 = vsel %vm24_vm0, %v13_v5, %v21_v6 }
  0x7a   :  { %29 = vst.msk [vmem:[#allocation2 + $0x8] sm:$0xff] %vm27_vm1, %v26_v7 }
  0x7b   :  { %61 = shalt.err (!%p58_p4)
}
  0x7c   :  { %s62_s22 = scalar_lea.hbm %s119_s2, 256 }
  0x7d   :  { %p63_p5 = scmp.ne.s32.totalorder %s119_s2, %s62_s22  ;;  %p66_p6 = scmp.lt.u32.totalorder %s62_s22, %s119_s2 }
  0x7f   :  { %p68_p7 = pnand %p66_p6, %p63_p5 }
  0x81   :  { %71 = shalt.err (!%p68_p7)
}
  0x82   :  { %s76_s26 = smov 128   ;;  %s77_s27 = smov 8  }
  0x83   :  { %41 = dma.vmem_to_hbm [thread:$0]  %s36_s17, 256, %s119_s2, [#allocation3], %s76_s26, %s76_s26, %s77_s27  }
  0x84   :  { %72 = dma.done.wait [#allocation3], 256  }
  0x85   :  { %73 = vsyncadd [#allocation3], 4294967040 }
  0x86   :  { %45 = vsyncpa [#allocation3], 1 }

// kernel: tpu_custom_call.1
= control target key start
LH: loop header
LB: loop body
LE: loop exit
PB: predicated region body
PF: predicated region fallthrough
CT: control target
= control target key end

     0   :  { %vm14_vm0 = vcmask 7168   ;;  %s74_s13 = smov 1   ;;  %s117_s0 = inlined_call_operand.vmem [shape: f32[16,1], index: 0, kind: input, shape index: {}]   ;;  %s118_s1 = inlined_call_operand.vmem [shape: f32[16,32], index: 1, kind: input, shape index: {}]   ;;  %s119_s2 = inlined_call_operand.hbm [shape: f32[16,33], index: 2, kind: output, shape index: {}]  }
   0x1   :  { %v17_v0 = vld [vmem:[%s118_s1] sm:$0xff]  ;;  %v13_v2 = vld [vmem:[%s117_s0 + $0x8] sm:$0xff] }
   0x2   :  { %v12_v1 = vld [vmem:[%s117_s0] sm:$0xff]  ;;  %21 = vrot.lane.b32.xlu0 %v17_v0, %s74_s13 }
   0x3   :  { %15 = vst.msk [vmem:[#allocation2] sm:$0xff] %vm14_vm0, %v12_v1 }
   0x4   :  { %7 = vsyncpa [#allocation3], 0  ;;  %v18_v3 = vld [vmem:[%s118_s1 + $0x8] sm:$0xff]  ;;  %16 = vst.msk [vmem:[#allocation2 + $0x8] sm:$0xff] %vm14_vm0, %v13_v2  ;;  %vm27_vm1 = vcmask 269320   ;;  %s75_s18 = smov [#allocation2]  }
   0x5   :  { %s35_s19 = sshll.u32 %s75_s18, 4  ;;  %s36_s19 = int_to_ptr.vmem [resolvable:$true] %s35_s19 }
   0x6   :  { %23 = vrot.lane.b32.xlu0 %v18_v3, %s74_s13  ;;  %s50_s20 = scalar_lea.vmem %s36_s19, 256  ;;  %p55_p1 = scmp.lt.s32.totalorder %s36_s19, %s36_s19 }
   0x7   :  { %p51_p0 = scmp.ne.s32.totalorder %s36_s19, %s50_s20  ;;  %p56_p2 = scmp.lt.s32.totalorder %s50_s20, %s50_s20 }
   0x9   :  { %p57_p3 = por %p56_p2, %p55_p1 }
   0xb   :  { %p58_p4 = pnand %p57_p3, %p51_p0 }
  0x74   :  { %v22_v4 = vpop.permute.xlu0 %21 }
  0x75   :  { %28 = vst.msk [vmem:[#allocation2] sm:$0xff] %vm27_vm1, %v22_v4 }
  0x78   :  { %v24_v5 = vpop.permute.xlu0 %23 }
  0x79   :  { %29 = vst.msk [vmem:[#allocation2 + $0x8] sm:$0xff] %vm27_vm1, %v24_v5 }
  0x7a   :  { %61 = shalt.err (!%p58_p4)
}
  0x7b   :  { %s62_s1 = scalar_lea.hbm %s119_s2, 256 }
  0x7c   :  { %p63_p5 = scmp.ne.s32.totalorder %s119_s2, %s62_s1  ;;  %p66_p6 = scmp.lt.u32.totalorder %s62_s1, %s119_s2 }
  0x7e   :  { %p68_p7 = pnand %p66_p6, %p63_p5 }
  0x80   :  { %71 = shalt.err (!%p68_p7)
}
  0x81   :  { %s76_s26 = smov 128   ;;  %s77_s27 = smov 8  }
  0x82   :  { %41 = dma.vmem_to_hbm [thread:$0]  %s36_s19, 256, %s119_s2, [#allocation3], %s76_s26, %s76_s26, %s77_s27  }
  0x83   :  { %72 = dma.done.wait [#allocation3], 256  }
  0x84   :  { %73 = vsyncadd [#allocation3], 4294967040 }
  0x85   :  { %45 = vsyncpa [#allocation3], 1 }

</bundles_post_ra>
